<compile_context>
chip_gen: v5e
topology: v5e:2x2
jax: 0.10.0
libtpu: 0.0.40
codegen_flags: <defaults>
</compile_context>

<pallas_src>
import math
from functools import partial

import jax
import jax.numpy as jnp
from jax import lax
from jax.experimental import pallas as pl
from jax.experimental.pallas import tpu as pltpu


# OGB molecular feature cardinalities (ogb.utils.features.get_atom/bond_feature_dims)
def get_atom_feature_dims():
    return [119, 5, 12, 12, 10, 6, 6, 2, 2]


def get_bond_feature_dims():
    return [5, 6, 2]


def _round_up(x, m):
    return ((x + m - 1) // m) * m


# ----------------------------- Pallas kernel -----------------------------

def _emb_sum_kernel(idx_ref, tab_ref, out_ref, *, offsets):
    """Fused multi-column embedding lookup + sum for one tile of rows.

    idx_ref: [tile, C] int32 categorical features (column c indexes vocab of size dim_c).
    tab_ref: [vocab_p, H_p] f32 concatenation of all per-column tables (column c's rows
             live at offsets[c] .. offsets[c]+dim_c), zero-padded to vocab_p rows.
    out_ref: [tile, H_p] f32 = sum_c tab[idx[:, c] + offsets[c]].
    """
    tile, num_cols = idx_ref.shape
    vocab_p = tab_ref.shape[0]

    idx = idx_ref[...]                                                   # [tile, C]
    iota = lax.broadcasted_iota(jnp.int32, (tile, vocab_p), 1)           # lane iota

    # Per-column one-hots live in disjoint vocab regions -> OR == sum.  Combine as
    # booleans (cheap VPU bit ops) and cast to f32 exactly once.
    hot = iota == (idx[:, 0:1] + offsets[0])
    for c in range(1, num_cols):                                         # C is tiny & static
        hot = jnp.logical_or(hot, iota == (idx[:, c:c + 1] + offsets[c]))

    # one MXU matmul performs the gather-and-sum over all feature columns at once
    out_ref[...] = jnp.dot(hot.astype(jnp.float32), tab_ref[...],
                           preferred_element_type=jnp.float32)


# ----------------------------- kernel wrapper -----------------------------

@partial(jax.jit, static_argnames=("offsets", "max_tile"))
def emb_sum(indices, table, offsets, *, max_tile=512):
    """Sum-of-embeddings for [N, C] int32 indices against a fused [vocab_p, H_p] table."""
    indices = indices.astype(jnp.int32)
    n, c = indices.shape
    vocab_p, h = table.shape

    tile = min(max_tile, _round_up(max(n, 8), 8))                        # sublane-aligned row tile
    num_tiles = pl.cdiv(n, tile)
    n_pad = num_tiles * tile
    if n_pad != n:
        indices = jnp.pad(indices, ((0, n_pad - n), (0, 0)))             # pad rows (sliced off below)

    out = pl.pallas_call(
        partial(_emb_sum_kernel, offsets=tuple(int(o) for o in offsets)),
        grid=(num_tiles,),
        in_specs=[
            pl.BlockSpec((tile, c), lambda i: (i, 0)),                   # row tile of indices
            pl.BlockSpec((vocab_p, h), lambda i: (0, 0)),                # whole table, VMEM-resident
        ],
        out_specs=pl.BlockSpec((tile, h), lambda i: (i, 0)),             # lane-dense stores
        out_shape=jax.ShapeDtypeStruct((n_pad, h), jnp.float32),
        compiler_params=pltpu.CompilerParams(dimension_semantics=("parallel",)),
    )(indices, table)
    return out[:n]


# ----------------------------- parameters -----------------------------

def init_graph_emb_params(key, dim_node_hidden, dim_edge_hidden):
    atom_dims = get_atom_feature_dims()
    bond_dims = get_bond_feature_dims()
    k_node, k_edge = jax.random.split(key)

    def build(k, dims, hidden):
        tables = []
        for kk, d in zip(jax.random.split(k, len(dims)), dims):
            a = math.sqrt(6.0 / (d + hidden))                            # xavier_uniform_
            tables.append(jax.random.uniform(kk, (d, hidden), jnp.float32, -a, a))
        tab = jnp.concatenate(tables, axis=0)
        total = sum(dims)
        vocab_p = _round_up(total, 128)                                  # lane-pad contraction axis
        hidden_p = _round_up(hidden, 128)                                # lane-pad output axis
        tab = jnp.pad(tab, ((0, vocab_p - total), (0, hidden_p - hidden)))
        offsets, acc = [], 0
        for d in dims:
            offsets.append(acc)
            acc += d
        return tab, tuple(offsets)

    node_tab, node_off = build(k_node, atom_dims, dim_node_hidden)
    edge_tab, edge_off = build(k_edge, bond_dims, dim_edge_hidden)
    return dict(node_table=node_tab, node_offsets=node_off, node_hidden=dim_node_hidden,
                edge_table=edge_tab, edge_offsets=edge_off, edge_hidden=dim_edge_hidden)


# ----------------------------- forward -----------------------------

def graph_emb_forward(params, node_attr, edge_attr):
    v_node = emb_sum(node_attr, params['node_table'], params['node_offsets'])
    v_edge = emb_sum(edge_attr, params['edge_table'], params['edge_offsets'])
    return v_node[:, :params['node_hidden']], v_edge[:, :params['edge_hidden']]


# ----------------------------- example -----------------------------

if __name__ == "__main__":
    DIM_NODE_HIDDEN = 128
    DIM_EDGE_HIDDEN = 128
    NUM_NODES, NUM_EDGES = 50, 100

    atom_dims = get_atom_feature_dims()
    bond_dims = get_bond_feature_dims()

    key = jax.random.PRNGKey(0)
    k_param, k_node, k_edge = jax.random.split(key, 3)

    node_attr = jnp.stack(
        [jax.random.randint(kk, (NUM_NODES,), 0, d, dtype=jnp.int32)
         for kk, d in zip(jax.random.split(k_node, len(atom_dims)), atom_dims)], axis=1)
    edge_attr = jnp.stack(
        [jax.random.randint(kk, (NUM_EDGES,), 0, d, dtype=jnp.int32)
         for kk, d in zip(jax.random.split(k_edge, len(bond_dims)), bond_dims)], axis=1)

    params = init_graph_emb_params(k_param, DIM_NODE_HIDDEN, DIM_EDGE_HIDDEN)

    v_node, v_edge = graph_emb_forward(params, node_attr, edge_attr)
    v_node = jax.block_until_ready(v_node)
    v_edge = jax.block_until_ready(v_edge)

    assert v_node.shape == (NUM_NODES, DIM_NODE_HIDDEN) and v_node.dtype == jnp.float32
    assert v_edge.shape == (NUM_EDGES, DIM_EDGE_HIDDEN) and v_edge.dtype == jnp.float32

    # pure-JAX reference: sum of per-column embedding gathers (= the PyTorch forward)
    def ref(attr, table, offsets, hidden):
        acc = jnp.zeros((attr.shape[0], table.shape[1]), jnp.float32)
        for c, off in enumerate(offsets):
            acc = acc + table[attr[:, c] + off]
        return acc[:, :hidden]

    ref_node = ref(node_attr, params['node_table'], params['node_offsets'], DIM_NODE_HIDDEN)
    ref_edge = ref(edge_attr, params['edge_table'], params['edge_offsets'], DIM_EDGE_HIDDEN)
    assert jnp.allclose(v_node, ref_node, atol=1e-5, rtol=1e-5)
    assert jnp.allclose(v_edge, ref_edge, atol=1e-5, rtol=1e-5)

    print("KERNEL_OK")
</pallas_src>

<mosaic_0001>
module attributes {stable_mosaic.version = 11 : i64} {
  func.func @_emb_sum_kernel(%arg0: i32, %arg1: memref<56x9xi32, #tpu.memory_space<vmem>>, %arg2: memref<256x128xf32, #tpu.memory_space<vmem>>, %arg3: memref<56x128xf32, #tpu.memory_space<vmem>>) attributes {dimension_semantics = [#tpu.dimension_semantics<parallel>], iteration_bounds = array<i64: 1>, scalar_prefetch = 0 : i64, scratch_operands = 0 : i64, tpu.core_type = #tpu.core_type<tc>, window_params = [{transform_indices = @transform_0, window_bounds = array<i64: 56, 9>}, {pipeline_mode = #tpu.pipeline_mode<synchronous>, transform_indices = @transform_1, window_bounds = array<i64: 256, 128>}, {transform_indices = @transform_2, window_bounds = array<i64: 56, 128>}]} {
    %c0 = arith.constant 0 : index
    %c0_0 = arith.constant 0 : index
    %0 = vector.load %arg1[%c0, %c0_0] : memref<56x9xi32, #tpu.memory_space<vmem>>, vector<56x9xi32>
    %1 = tpu.iota {dimensions = array<i32: 1>} : vector<56x256xi32>
    %2 = vector.extract_strided_slice %0 {offsets = [0, 0], sizes = [56, 1], strides = [1, 1]} : vector<56x9xi32> to vector<56x1xi32>
    %c0_i32 = arith.constant 0 : i32
    %3 = vector.broadcast %c0_i32 : i32 to vector<56x1xi32>
    %4 = arith.addi %2, %3 : vector<56x1xi32>
    %5 = vector.broadcast %4 : vector<56x1xi32> to vector<56x256xi32>
    %6 = arith.cmpi eq, %1, %5 : vector<56x256xi32>
    %7 = vector.extract_strided_slice %0 {offsets = [0, 1], sizes = [56, 1], strides = [1, 1]} : vector<56x9xi32> to vector<56x1xi32>
    %c119_i32 = arith.constant 119 : i32
    %8 = vector.broadcast %c119_i32 : i32 to vector<56x1xi32>
    %9 = arith.addi %7, %8 : vector<56x1xi32>
    %10 = vector.broadcast %9 : vector<56x1xi32> to vector<56x256xi32>
    %11 = arith.cmpi eq, %1, %10 : vector<56x256xi32>
    %12 = arith.ori %6, %11 : vector<56x256xi1>
    %13 = vector.extract_strided_slice %0 {offsets = [0, 2], sizes = [56, 1], strides = [1, 1]} : vector<56x9xi32> to vector<56x1xi32>
    %c124_i32 = arith.constant 124 : i32
    %14 = vector.broadcast %c124_i32 : i32 to vector<56x1xi32>
    %15 = arith.addi %13, %14 : vector<56x1xi32>
    %16 = vector.broadcast %15 : vector<56x1xi32> to vector<56x256xi32>
    %17 = arith.cmpi eq, %1, %16 : vector<56x256xi32>
    %18 = arith.ori %12, %17 : vector<56x256xi1>
    %19 = vector.extract_strided_slice %0 {offsets = [0, 3], sizes = [56, 1], strides = [1, 1]} : vector<56x9xi32> to vector<56x1xi32>
    %c136_i32 = arith.constant 136 : i32
    %20 = vector.broadcast %c136_i32 : i32 to vector<56x1xi32>
    %21 = arith.addi %19, %20 : vector<56x1xi32>
    %22 = vector.broadcast %21 : vector<56x1xi32> to vector<56x256xi32>
    %23 = arith.cmpi eq, %1, %22 : vector<56x256xi32>
    %24 = arith.ori %18, %23 : vector<56x256xi1>
    %25 = vector.extract_strided_slice %0 {offsets = [0, 4], sizes = [56, 1], strides = [1, 1]} : vector<56x9xi32> to vector<56x1xi32>
    %c148_i32 = arith.constant 148 : i32
    %26 = vector.broadcast %c148_i32 : i32 to vector<56x1xi32>
    %27 = arith.addi %25, %26 : vector<56x1xi32>
    %28 = vector.broadcast %27 : vector<56x1xi32> to vector<56x256xi32>
    %29 = arith.cmpi eq, %1, %28 : vector<56x256xi32>
    %30 = arith.ori %24, %29 : vector<56x256xi1>
    %31 = vector.extract_strided_slice %0 {offsets = [0, 5], sizes = [56, 1], strides = [1, 1]} : vector<56x9xi32> to vector<56x1xi32>
    %c158_i32 = arith.constant 158 : i32
    %32 = vector.broadcast %c158_i32 : i32 to vector<56x1xi32>
    %33 = arith.addi %31, %32 : vector<56x1xi32>
    %34 = vector.broadcast %33 : vector<56x1xi32> to vector<56x256xi32>
    %35 = arith.cmpi eq, %1, %34 : vector<56x256xi32>
    %36 = arith.ori %30, %35 : vector<56x256xi1>
    %37 = vector.extract_strided_slice %0 {offsets = [0, 6], sizes = [56, 1], strides = [1, 1]} : vector<56x9xi32> to vector<56x1xi32>
    %c164_i32 = arith.constant 164 : i32
    %38 = vector.broadcast %c164_i32 : i32 to vector<56x1xi32>
    %39 = arith.addi %37, %38 : vector<56x1xi32>
    %40 = vector.broadcast %39 : vector<56x1xi32> to vector<56x256xi32>
    %41 = arith.cmpi eq, %1, %40 : vector<56x256xi32>
    %42 = arith.ori %36, %41 : vector<56x256xi1>
    %43 = vector.extract_strided_slice %0 {offsets = [0, 7], sizes = [56, 1], strides = [1, 1]} : vector<56x9xi32> to vector<56x1xi32>
    %c170_i32 = arith.constant 170 : i32
    %44 = vector.broadcast %c170_i32 : i32 to vector<56x1xi32>
    %45 = arith.addi %43, %44 : vector<56x1xi32>
    %46 = vector.broadcast %45 : vector<56x1xi32> to vector<56x256xi32>
    %47 = arith.cmpi eq, %1, %46 : vector<56x256xi32>
    %48 = arith.ori %42, %47 : vector<56x256xi1>
    %49 = vector.extract_strided_slice %0 {offsets = [0, 8], sizes = [56, 1], strides = [1, 1]} : vector<56x9xi32> to vector<56x1xi32>
    %c172_i32 = arith.constant 172 : i32
    %50 = vector.broadcast %c172_i32 : i32 to vector<56x1xi32>
    %51 = arith.addi %49, %50 : vector<56x1xi32>
    %52 = vector.broadcast %51 : vector<56x1xi32> to vector<56x256xi32>
    %53 = arith.cmpi eq, %1, %52 : vector<56x256xi32>
    %54 = arith.ori %48, %53 : vector<56x256xi1>
    %55 = arith.extui %54 : vector<56x256xi1> to vector<56x256xi32>
    %56 = arith.sitofp %55 : vector<56x256xi32> to vector<56x256xf32>
    %c0_1 = arith.constant 0 : index
    %c0_2 = arith.constant 0 : index
    %57 = vector.load %arg2[%c0_1, %c0_2] : memref<256x128xf32, #tpu.memory_space<vmem>>, vector<256x128xf32>
    %cst = arith.constant dense<0.000000e+00> : vector<56x128xf32>
    %58 = tpu.matmul %56, %57, %cst {dimension_numbers = #tpu.dot_dimension_numbers<[1], [0], [0], [1], [0, 0, 1, 1], [], []>} : vector<56x256xf32>, vector<256x128xf32>, vector<56x128xf32> -> vector<56x128xf32>
    %c0_3 = arith.constant 0 : index
    %c0_4 = arith.constant 0 : index
    %59 = vector.load %arg3[%c0_3, %c0_4] : memref<56x128xf32, #tpu.memory_space<vmem>>, vector<56x128xf32>
    tpu.vector_store %arg3[%c0_3, %c0_4], %58 {strides = array<i32>} : memref<56x128xf32, #tpu.memory_space<vmem>>, vector<56x128xf32>,
    return
  }
  func.func @transform_0(%arg0: i32) -> (i32, i32) {
    %c0_i32 = arith.constant 0 : i32
    %c0_i32_0 = arith.constant 0 : i32
    return %arg0, %c0_i32 : i32, i32
  }
  func.func @transform_1(%arg0: i32) -> (i32, i32) {
    %c0_i32 = arith.constant 0 : i32
    %c0_i32_0 = arith.constant 0 : i32
    %c0_i32_1 = arith.constant 0 : i32
    return %c0_i32, %c0_i32_0 : i32, i32
  }
  func.func @transform_2(%arg0: i32) -> (i32, i32) {
    %c0_i32 = arith.constant 0 : i32
    %c0_i32_0 = arith.constant 0 : i32
    return %arg0, %c0_i32 : i32, i32
  }
}

</mosaic_0001>

<bundles_post_ra>
// kernel: emb_sum.1
= control target key start
LH: loop header
LB: loop body
LE: loop exit
PB: predicated region body
PF: predicated region fallthrough
CT: control target
= control target key end

     0   :  { %7 = vsyncpa [#allocation3], 0  ;;  %s1449_s0 = inlined_call_operand.vmem [shape: s32[56,9], index: 0, kind: input, shape index: {}]   ;;  %s1450_s1 = inlined_call_operand.hbm [shape: f32[256,128], index: 1, kind: input, shape index: {}]   ;;  %s1451_s2 = inlined_call_operand.hbm [shape: f32[56,128], index: 2, kind: output, shape index: {}]  }
   0x1   :  { %8 = vsyncpa [#allocation4], 0  ;;  %s15_s11 = sshll.u32 %s1450_s1, 4  ;;  %s832_s12 = smov [#allocation2]   ;;  %s16_s11 = int_to_ptr.hbm [resolvable:$true] %s15_s11 }
   0x2   :  { %s17_s13 = sshll.u32 %s832_s12, 4  ;;  %s833_s14 = smov 128   ;;  %s18_s13 = int_to_ptr.vmem [resolvable:$true] %s17_s13 }
   0x3   :  { %s834_s15 = smov 8  }
   0x4   :  { %23 = dma.hbm_to_vmem [thread:$0]  %s16_s11, 4096, %s18_s13, [#allocation3], %s833_s14, %s833_s14, %s834_s15  }
   0x5   :  { %828 = dma.done.wait [#allocation3], 4096  }
   0x6   :  { %829 = vsyncadd [#allocation3], 4294963200  ;;  %v835_v0 = vmov 0   ;;  %v870_v1 = vld [vmem:[%s1449_s0 + $0x20] sm:$0xff]  ;;  %v875_v2 = vld [vmem:[%s1449_s0 + $0x10] sm:$0xff]  ;;  %v836_v10 = vmov 1   ;;  %v35_v50 = vlaneseq }
   0x7   :  { %745 = vset.pattern.permute.xlu2 %v835_v0  ;;  %744 = vset.pattern.permute.xlu1 %v835_v0  ;;  %v880_v3 = vld [vmem:[%s1449_s0] sm:$0xff]  ;;  %v888_v4 = vld [vmem:[%s1449_s0 + $0x28] sm:$0xff]  ;;  %v893_v5 = vld [vmem:[%s1449_s0 + $0x18] sm:$0xff]  ;;  %v77_v11 = vadd.s32 119, %v870_v1  ;;  %v75_v12 = vadd.s32 119, %v875_v2  ;;  %v837_v17 = vmov 2  }
   0x8   :  { %743 = vset.pattern.permute.xlu0 %v835_v0  ;;  %51 = vperm.xlu2 %745, %v870_v1   ;;  %v898_v6 = vld [vmem:[%s1449_s0 + $0x8] sm:$0xff]  ;;  %v907_v8 = vld [vmem:[%s1449_s0 + $0x30] sm:$0xff]  ;;  %v73_v9 = vadd.s32 119, %v880_v3  ;;  %v76_v13 = vadd.s32 119, %v893_v5  ;;  %v78_v15 = vadd.s32 119, %v888_v4  ;;  %v129_v16 = vadd.s32 124, %v880_v3 }
   0x9   :  { %45 = vperm.xlu1 %744, %v875_v2   ;;  %39 = vperm.xlu0 %743, %v880_v3   ;;  %v74_v7 = vadd.s32 119, %v898_v6  ;;  %v79_v14 = vadd.s32 119, %v907_v8  ;;  %v131_v18 = vadd.s32 124, %v875_v2  ;;  %v134_v19 = vadd.s32 124, %v888_v4  ;;  %v560_v60 = vld [vmem:[#allocation2 + $0x58] sm:$0xff]  ;;  %s845_s0 = smov [#allocation5]  }
   0xa   :  { %v130_v20 = vadd.s32 124, %v898_v6  ;;  %v133_v21 = vadd.s32 124, %v870_v1  ;;  %v132_v22 = vadd.s32 124, %v893_v5  ;;  %v186_v23 = vadd.s32 136, %v898_v6  ;;  %s668_s29 = sshll.u32 %s845_s0, 4  ;;  %s670_s4 = sshll.u32 %s1451_s2, 4  ;;  %s669_s29 = int_to_ptr.vmem [resolvable:$true] %s668_s29  ;;  %s671_s4 = int_to_ptr.hbm [resolvable:$true] %s670_s4 }
   0xb   :  { %v838_v24 = vmov 3   ;;  %v135_v25 = vadd.s32 124, %v907_v8  ;;  %v185_v26 = vadd.s32 136, %v880_v3  ;;  %v191_v27 = vadd.s32 136, %v907_v8 }
   0xc   :  { %v188_v28 = vadd.s32 136, %v893_v5  ;;  %v187_v29 = vadd.s32 136, %v875_v2  ;;  %v300_v30 = vadd.s32 158, %v893_v5  ;;  %v839_v31 = vmov 5  }
   0xd   :  { %v190_v32 = vadd.s32 136, %v888_v4  ;;  %v189_v33 = vadd.s32 136, %v870_v1  ;;  %v245_v34 = vadd.s32 148, %v870_v1  ;;  %v840_v35 = vmov 4  }
   0xe   :  { %v244_v36 = vadd.s32 148, %v893_v5  ;;  %v241_v37 = vadd.s32 148, %v880_v3  ;;  %v246_v38 = vadd.s32 148, %v888_v4  ;;  %v412_v39 = vadd.s32 170, %v893_v5 }
   0xf   :  { %v247_v41 = vadd.s32 148, %v907_v8  ;;  %v356_v42 = vadd.s32 164, %v893_v5  ;;  %v841_v43 = vmov 7   ;;  %v842_v44 = vmov 6  }
  0x10   :  { %54 = vperm.xlu2 %745, %v888_v4   ;;  %v297_v46 = vadd.s32 158, %v880_v3  ;;  %v468_v47 = vadd.s32 172, %v893_v5  ;;  %v465_v48 = vadd.s32 172, %v880_v3  ;;  %v843_v49 = vmov 8  }
  0x11   :  { %48 = vperm.xlu1 %744, %v893_v5   ;;  %42 = vperm.xlu0 %743, %v898_v6   ;;  %v301_v51 = vadd.s32 158, %v870_v1  ;;  %v953_v52 = vand.u32 127, %v35_v50  ;;  %v353_v54 = vadd.s32 164, %v880_v3  ;;  %v357_v59 = vadd.s32 164, %v870_v1 }
  0x12   :  { %v409_v61 = vadd.s32 170, %v880_v3  ;;  %v469_v3 = vadd.s32 172, %v870_v1  ;;  %v470_v50 = vadd.s32 172, %v888_v4 }
  0x13   :  { %v957_v55 = vadd.s32 128, %v953_v52 }
  0x18   :  { %747 = vset.pattern.permute.xlu2 %v836_v10 }
  0x19   :  { %746 = vset.pattern.permute.xlu1 %v836_v10  ;;  %57 = vperm.xlu0 %743, %v907_v8  }
  0x1a   :  { %84 = vperm.xlu2 %747, %v74_v7   ;;  %81 = vperm.xlu1 %746, %v73_v9   ;;  %v413_v9 = vadd.s32 170, %v870_v1  ;;  %v1501_v7 = vmov 0 }
  0x21   :  { %748 = vset.pattern.permute.xlu0 %v836_v10  ;;  %v466_v10 = vadd.s32 172, %v898_v6 }
  0x22   :  { %93 = vperm.xlu2 %747, %v77_v11   ;;  %87 = vperm.xlu0 %748, %v75_v12   ;;  %v1458_v11 = vmov 0 }
  0x23   :  { %90 = vperm.xlu1 %746, %v76_v13  }
  0x2a   :  { %99 = vperm.xlu2 %747, %v79_v14   ;;  %749 = vset.pattern.permute.xlu0 %v837_v17  ;;  %v1460_v14 = vmov 0 }
  0x2b   :  { %96 = vperm.xlu1 %746, %v78_v15   ;;  %137 = vperm.xlu0 %749, %v129_v16   ;;  %v298_v15 = vadd.s32 158, %v898_v6  ;;  %v1462_v16 = vmov 0 }
  0x32   :  { %751 = vset.pattern.permute.xlu2 %v837_v17 }
  0x33   :  { %750 = vset.pattern.permute.xlu1 %v837_v17  ;;  %143 = vperm.xlu2 %751, %v131_v18   ;;  %v242_v17 = vadd.s32 148, %v898_v6  ;;  %v1464_v18 = vmov 0 }
  0x34   :  { %152 = vperm.xlu0 %749, %v134_v19   ;;  %140 = vperm.xlu1 %750, %v130_v20   ;;  %v1466_v19 = vmov 0 }
  0x3b   :  { %149 = vperm.xlu2 %751, %v133_v21  }
  0x3c   :  { %753 = vset.pattern.permute.xlu0 %v838_v24  ;;  %146 = vperm.xlu1 %750, %v132_v22  }
  0x3d   :  { %196 = vperm.xlu0 %753, %v186_v23   ;;  %v302_v23 = vadd.s32 158, %v888_v4 }
  0x43   :  { %752 = vset.pattern.permute.xlu2 %v838_v24 }
  0x44   :  { %155 = vperm.xlu1 %750, %v135_v25   ;;  %193 = vperm.xlu2 %752, %v185_v26   ;;  %v354_v26 = vadd.s32 164, %v898_v6  ;;  %v554_v25 = vld [vmem:[#allocation2 + $0x28] sm:$0xff] }
  0x45   :  { %211 = vperm.xlu0 %753, %v191_v27   ;;  %v565_v27 = vld [vmem:[#allocation2 + $0x80] sm:$0xff] }
  0x4c   :  { %754 = vset.pattern.permute.xlu1 %v838_v24  ;;  %202 = vperm.xlu2 %752, %v188_v28   ;;  %v580_v24 = vld [vmem:[#allocation2 + $0xf8] sm:$0xff] }
  0x4d   :  { %757 = vset.pattern.permute.xlu0 %v839_v31  ;;  %199 = vperm.xlu1 %754, %v187_v29  }
  0x4e   :  { %314 = vperm.xlu0 %757, %v300_v30   ;;  %v1478_v30 = vmov 0  ;;  %619 = vmatpush.msra.mxu1 %v580_v24 }
  0x4f   :  { %713 = vmatpush.msra.mxu3 %v580_v24 }
  0x54   :  { %208 = vperm.xlu2 %752, %v190_v32  }
  0x55   :  { %205 = vperm.xlu1 %754, %v189_v33   ;;  %v551_v33 = vld [vmem:[#allocation2 + $0x10] sm:$0xff] }
  0x56   :  { %762 = vset.pattern.permute.xlu0 %v840_v35 }
  0x57   :  { %261 = vperm.xlu0 %762, %v245_v34  }
  0x5c   :  { %756 = vset.pattern.permute.xlu2 %v840_v35 }
  0x5d   :  { %755 = vset.pattern.permute.xlu1 %v840_v35  ;;  %258 = vperm.xlu2 %756, %v244_v36  }
  0x5e   :  { %249 = vperm.xlu1 %755, %v241_v37   ;;  %v467_v37 = vadd.s32 172, %v875_v2 }
  0x5f   :  { %264 = vperm.xlu0 %762, %v246_v38   ;;  %v411_v38 = vadd.s32 170, %v875_v2 }
  0x62   :  { %v52_v40 = vpop.permute.xlu2 %51 }
  0x63   :  { %vm67_vm0 = vcmp.eq.s32.totalorder %v953_v52, %v52_v40  ;;  %vm68_vm1 = vcmp.eq.s32.totalorder %v957_v55, %v52_v40  ;;  %v358_v40 = vadd.s32 164, %v888_v4 }
  0x65   :  { %759 = vset.pattern.permute.xlu2 %v841_v43 }
  0x66   :  { %758 = vset.pattern.permute.xlu1 %v842_v44  ;;  %426 = vperm.xlu2 %759, %v412_v39   ;;  %v578_v39 = vld [vmem:[#allocation2 + $0xe8] sm:$0xff] }
  0x67   :  { %267 = vperm.xlu0 %762, %v247_v41   ;;  %370 = vperm.xlu1 %758, %v356_v42   ;;  %v410_v42 = vadd.s32 170, %v898_v6  ;;  %v552_v41 = vld [vmem:[#allocation2 + $0x18] sm:$0xff] }
  0x68   :  { %v576_v6 = vld [vmem:[#allocation2 + $0xd8] sm:$0xff] }
  0x6a   :  { %v944_v45 = vpop.permute.xlu2 %54 }
  0x6e   :  { %761 = vset.pattern.permute.xlu2 %v839_v31 }
  0x6f   :  { %760 = vset.pattern.permute.xlu1 %v843_v49  ;;  %305 = vperm.xlu2 %761, %v297_v46  }
  0x70   :  { %482 = vperm.xlu1 %760, %v468_v47   ;;  %775 = vset.pattern.permute.xlu0 %v843_v49 }
  0x71   :  { %473 = vperm.xlu0 %775, %v465_v48  }
  0x74   :  { %v85_v53 = vpop.permute.xlu2 %84 }
  0x75   :  { %vm103_vm6 = vcmp.eq.s32.totalorder %v953_v52, %v85_v53  ;;  %vm104_vm7 = vcmp.eq.s32.totalorder %v957_v55, %v85_v53  ;;  %v414_v53 = vadd.s32 170, %v888_v4 }
  0x77   :  { %317 = vperm.xlu2 %761, %v301_v51   ;;  %v575_v51 = vld [vmem:[#allocation2 + $0xd0] sm:$0xff] }
  0x78   :  { %763 = vset.pattern.permute.xlu1 %v842_v44 }
  0x79   :  { %361 = vperm.xlu1 %763, %v353_v54   ;;  %476 = vperm.xlu0 %775, %v466_v10   ;;  %v1503_v10 = vmov 0  ;;  %v549_v54 = vld [vmem:[#allocation2] sm:$0xff] }
  0x7b   :  { %v961_v56 = vpop.permute.xlu1 %45  ;;  %v40_v58 = vpop.permute.xlu0 %39 }
  0x7c   :  { %v94_v57 = vpop.permute.xlu2 %93  ;;  %vm59_vm14 = vcmp.eq.s32.totalorder %v953_v52, %v40_v58 }
  0x7d   :  { %vm109_vm2 = vcmp.eq.s32.totalorder %v953_v52, %v94_v57  ;;  %vm110_vm3 = vcmp.eq.s32.totalorder %v957_v55, %v94_v57  ;;  %v471_v57 = vadd.s32 172, %v907_v8 }
  0x7e   :  { %vm967_vm4 = vmor %vm67_vm0, %vm109_vm2 }
  0x7f   :  { %vm972_vm5 = vmor %vm68_vm1, %vm110_vm3  ;;  %765 = vset.pattern.permute.xlu2 %v842_v44  ;;  %vm60_vm1 = vcmp.eq.s32.totalorder %v957_v55, %v40_v58  ;;  %v562_v58 = vld [vmem:[#allocation2 + $0x68] sm:$0xff] }
  0x80   :  { %373 = vperm.xlu2 %765, %v357_v59   ;;  %v561_v59 = vld [vmem:[#allocation2 + $0x60] sm:$0xff] }
  0x81   :  { %764 = vset.pattern.permute.xlu1 %v841_v43  ;;  %479 = vperm.xlu0 %775, %v467_v37   ;;  %v553_v37 = vld [vmem:[#allocation2 + $0x20] sm:$0xff] }
  0x82   :  { %417 = vperm.xlu1 %764, %v409_v61  }
  0x83   :  { %v49_v63 = vpop.permute.xlu1 %48  ;;  %v43_v0 = vpop.permute.xlu0 %42 }
  0x84   :  { %v100_v5 = vpop.permute.xlu2 %99  ;;  %vm61_vm8 = vcmp.eq.s32.totalorder %v953_v52, %v43_v0  ;;  %vm62_vm9 = vcmp.eq.s32.totalorder %v957_v55, %v43_v0  ;;  %v299_v0 = vadd.s32 158, %v875_v2 }
  0x85   :  { %vm983_vm10 = vmor %vm61_vm8, %vm103_vm6  ;;  %vm113_vm12 = vcmp.eq.s32.totalorder %v953_v52, %v100_v5  ;;  %vm114_vm13 = vcmp.eq.s32.totalorder %v957_v55, %v100_v5  ;;  %v1499_v5 = vmov 0 }
  0x86   :  { %vm989_vm11 = vmor %vm62_vm9, %vm104_vm7 }
  0x87   :  { %v1459_v11 = vsel %vm989_vm11, 4294967295, %v1458_v11 }
  0x88   :  { %766 = vset.pattern.permute.xlu2 %v843_v49 }
  0x89   :  { %485 = vperm.xlu2 %766, %v469_v3   ;;  %v243_v3 = vadd.s32 148, %v875_v2 }
  0x8a   :  { %429 = vperm.xlu1 %764, %v413_v9   ;;  %v559_v9 = vld [vmem:[#allocation2 + $0x50] sm:$0xff] }
  0x8b   :  { %v58_v12 = vpop.permute.xlu0 %57 }
  0x8c   :  { %vm71_vm15 = vcmp.eq.s32.totalorder %v953_v52, %v58_v12  ;;  %vm72_vm0 = vcmp.eq.s32.totalorder %v957_v55, %v58_v12  ;;  %v82_v1 = vpop.permute.xlu1 %81 }
  0x8d   :  { %v144_v13 = vpop.permute.xlu2 %143  ;;  %vm1000_vm2 = vmor %vm71_vm15, %vm113_vm12  ;;  %vm101_vm3 = vcmp.eq.s32.totalorder %v953_v52, %v82_v1  ;;  %vm102_vm6 = vcmp.eq.s32.totalorder %v957_v55, %v82_v1  ;;  %vm63_vm12 = vcmp.eq.s32.totalorder %v953_v52, %v961_v56 }
  0x8e   :  { %v1461_v14 = vsel %vm1000_vm2, 4294967295, %v1460_v14  ;;  %vm1007_vm7 = vmor %vm72_vm0, %vm114_vm13  ;;  %vm64_vm0 = vcmp.eq.s32.totalorder %v957_v55, %v961_v56  ;;  %v563_v56 = vld [vmem:[#allocation2 + $0x70] sm:$0xff] }
  0x8f   :  { %v1463_v16 = vsel %vm1007_vm7, 4294967295, %v1462_v16  ;;  %vm1012_vm8 = vmor %vm59_vm14, %vm101_vm3  ;;  %vm66_vm7 = vcmp.eq.s32.totalorder %v957_v55, %v49_v63 }
  0x90   :  { %v1465_v18 = vsel %vm1012_vm8, 4294967295, %v1464_v18  ;;  %vm1016_vm9 = vmor %vm60_vm1, %vm102_vm6  ;;  %vm65_vm6 = vcmp.eq.s32.totalorder %v953_v52, %v49_v63 }
  0x91   :  { %v1467_v19 = vsel %vm1016_vm9, 4294967295, %v1466_v19  ;;  %768 = vset.pattern.permute.xlu2 %v839_v31 }
  0x92   :  { %767 = vset.pattern.permute.xlu1 %v840_v35  ;;  %308 = vperm.xlu2 %768, %v298_v15   ;;  %v558_v15 = vld [vmem:[#allocation2 + $0x48] sm:$0xff] }
  0x93   :  { %252 = vperm.xlu1 %767, %v242_v17   ;;  %v557_v17 = vld [vmem:[#allocation2 + $0x40] sm:$0xff] }
  0x94   :  { %v88_v20 = vpop.permute.xlu0 %87 }
  0x95   :  { %v91_v21 = vpop.permute.xlu1 %90  ;;  %vm105_vm13 = vcmp.eq.s32.totalorder %v953_v52, %v88_v20  ;;  %vm106_vm14 = vcmp.eq.s32.totalorder %v957_v55, %v88_v20  ;;  %v150_v22 = vpop.permute.xlu2 %149  ;;  %v556_v20 = vld [vmem:[#allocation2 + $0x38] sm:$0xff] }
  0x96   :  { %vm107_vm15 = vcmp.eq.s32.totalorder %v953_v52, %v91_v21  ;;  %vm1030_vm1 = vmor %vm63_vm12, %vm105_vm13  ;;  %vm108_vm3 = vcmp.eq.s32.totalorder %v957_v55, %v91_v21  ;;  %vm165_vm8 = vcmp.eq.s32.totalorder %v953_v52, %v150_v22  ;;  %vm166_vm12 = vcmp.eq.s32.totalorder %v957_v55, %v150_v22 }
  0x97   :  { %vm1036_vm9 = vmor %vm64_vm0, %vm106_vm14  ;;  %vm161_vm13 = vcmp.eq.s32.totalorder %v953_v52, %v144_v13  ;;  %vm162_vm14 = vcmp.eq.s32.totalorder %v957_v55, %v144_v13  ;;  %v355_v22 = vadd.s32 164, %v875_v2 }
  0x98   :  { %vm1043_vm2 = vmor %vm65_vm6, %vm107_vm15 }
  0x99   :  { %vm1049_vm11 = vmor %vm66_vm7, %vm108_vm3 }
  0x9a   :  { %320 = vperm.xlu2 %768, %v302_v23   ;;  %vm1056_vm0 = vmor %vm967_vm4, %vm165_vm8  ;;  %vm69_vm4 = vcmp.eq.s32.totalorder %v953_v52, %v944_v45 }
  0x9b   :  { %769 = vset.pattern.permute.xlu1 %v842_v44  ;;  %vm1063_vm15 = vmor %vm972_vm5, %vm166_vm12 }
  0x9c   :  { %v1479_v30 = vsel %vm1063_vm15, 4294967295, %v1478_v30  ;;  %364 = vperm.xlu1 %769, %v354_v26   ;;  %vm1069_vm7 = vmor %vm1030_vm1, %vm161_vm13  ;;  %vm70_vm1 = vcmp.eq.s32.totalorder %v957_v55, %v944_v45  ;;  %v564_v45 = vld [vmem:[#allocation2 + $0x78] sm:$0xff] }
  0x9d   :  { %v97_v32 = vpop.permute.xlu1 %96  ;;  %v1077_v34 = vpop.permute.xlu0 %137  ;;  %vm1084_vm5 = vmor %vm1036_vm9, %vm162_vm14  ;;  %697 = vmatpush.msra.mxu2 %v564_v45  ;;  %581 = vmatpush.msra.mxu0 %v564_v45  ;;  %v359_v45 = vadd.s32 164, %v907_v8 }
  0x9e   :  { %vm111_vm8 = vcmp.eq.s32.totalorder %v953_v52, %v97_v32  ;;  %vm112_vm3 = vcmp.eq.s32.totalorder %v957_v55, %v97_v32  ;;  %v1079_v36 = vpop.permute.xlu2 %193  ;;  %v579_v32 = vld [vmem:[#allocation2 + $0xf0] sm:$0xff] }
  0x9f   :  { %vm1090_vm6 = vmor %vm69_vm4, %vm111_vm8  ;;  %698 = vmatpush.msra.mxu2 %v563_v56  ;;  %582 = vmatpush.msra.mxu0 %v563_v56  ;;  %v574_v56 = vld [vmem:[#allocation2 + $0xc8] sm:$0xff] }
  0xa0   :  { %vm1095_vm12 = vmor %vm70_vm1, %vm112_vm3  ;;  %620 = vmatpush.msra.mxu1 %v579_v32  ;;  %714 = vmatpush.msra.mxu3 %v579_v32 }
  0xa1   :  { %699 = vmatpush.msra.mxu2 %v562_v58  ;;  %583 = vmatpush.msra.mxu0 %v562_v58  ;;  %v415_v58 = vadd.s32 170, %v907_v8 }
  0xa2   :  { %771 = vset.pattern.permute.xlu2 %v842_v44  ;;  %621 = vmatpush.msra.mxu1 %v578_v39 }
  0xa3   :  { %376 = vperm.xlu2 %771, %v358_v40   ;;  %700 = vmatpush.msra.mxu2 %v561_v59  ;;  %v1517_v40 = vmov 0 }
  0xa4   :  { %770 = vset.pattern.permute.xlu1 %v841_v43  ;;  %584 = vmatpush.msra.mxu0 %v561_v59 }
  0xa5   :  { %420 = vperm.xlu1 %770, %v410_v42   ;;  %701 = vmatpush.msra.mxu2 %v560_v60  ;;  %v1519_v42 = vmov 0 }
  0xa6   :  { %v153_v46 = vpop.permute.xlu0 %152  ;;  %v141_v47 = vpop.permute.xlu1 %140  ;;  %585 = vmatpush.msra.mxu0 %v560_v60  ;;  %715 = vmatpush.msra.mxu3 %v578_v39  ;;  %v571_v60 = vld [vmem:[#allocation2 + $0xb0] sm:$0xff]  ;;  %v1546_v39 = vmov 0 }
  0xa7   :  { %vm167_vm9 = vcmp.eq.s32.totalorder %v953_v52, %v153_v46  ;;  %vm168_vm13 = vcmp.eq.s32.totalorder %v957_v55, %v153_v46  ;;  %vm159_vm14 = vcmp.eq.s32.totalorder %v953_v52, %v141_v47  ;;  %v1105_v48 = vpop.permute.xlu2 %202  ;;  %vm160_vm8 = vcmp.eq.s32.totalorder %v957_v55, %v141_v47  ;;  %702 = vmatpush.msra.mxu2 %v559_v9  ;;  %v577_v46 = vld [vmem:[#allocation2 + $0xe0] sm:$0xff] }
  0xa8   :  { %vm1109_vm4 = vmor %vm1090_vm6, %vm167_vm9  ;;  %vm1494_vm6 = vnez %v1459_v11  ;;  %v1505_v11 = vmov 0  ;;  %586 = vmatpush.msra.mxu0 %v559_v9  ;;  %622 = vmatpush.msra.mxu1 %v577_v46  ;;  %v566_v9 = vld [vmem:[#allocation2 + $0x88] sm:$0xff] }
  0xa9   :  { %vm1117_vm3 = vmor %vm1095_vm12, %vm168_vm13  ;;  %703 = vmatpush.msra.mxu2 %v558_v15  ;;  %716 = vmatpush.msra.mxu3 %v577_v46 }
  0xaa   :  { %vm1124_vm1 = vmor %vm983_vm10, %vm159_vm14  ;;  %587 = vmatpush.msra.mxu0 %v558_v15  ;;  %623 = vmatpush.msra.mxu1 %v576_v6  ;;  %v844_v15 = vmov 0.0  }
  0xab   :  { %vm1130_vm9 = vmor %vm1494_vm6, %vm160_vm8  ;;  %772 = vset.pattern.permute.xlu2 %v843_v49  ;;  %704 = vmatpush.msra.mxu2 %v557_v17 }
  0xac   :  { %488 = vperm.xlu2 %772, %v470_v50   ;;  %588 = vmatpush.msra.mxu0 %v557_v17  ;;  %v550_v50 = vld [vmem:[#allocation2 + $0x8] sm:$0xff] }
  0xad   :  { %432 = vperm.xlu1 %770, %v414_v53   ;;  %705 = vmatpush.msra.mxu2 %v556_v20 }
  0xae   :  { %v1135_v4 = vpop.permute.xlu1 %146  ;;  %589 = vmatpush.msra.mxu0 %v556_v20  ;;  %624 = vmatpush.msra.mxu1 %v575_v51 }
  0xaf   :  { %vm164_vm10 = vcmp.eq.s32.totalorder %v957_v55, %v1135_v4  ;;  %v209_v61 = vpop.permute.xlu2 %208  ;;  %v197_v62 = vpop.permute.xlu0 %196  ;;  %717 = vmatpush.msra.mxu3 %v576_v6 }
  0xb0   :  { %vm223_vm12 = vcmp.eq.s32.totalorder %v953_v52, %v209_v61  ;;  %vm224_vm13 = vcmp.eq.s32.totalorder %v957_v55, %v209_v61  ;;  %vm1143_vm14 = vmor %vm1049_vm11, %vm164_vm10  ;;  %vm215_vm8 = vcmp.eq.s32.totalorder %v953_v52, %v197_v62  ;;  %vm216_vm15 = vcmp.eq.s32.totalorder %v957_v55, %v197_v62  ;;  %625 = vmatpush.msra.mxu1 %v574_v56  ;;  %v570_v62 = vld [vmem:[#allocation2 + $0xa8] sm:$0xff] }
  0xb1   :  { %vm1151_vm6 = vmor %vm1109_vm4, %vm223_vm12  ;;  %vm220_vm10 = vcmp.eq.s32.totalorder %v957_v55, %v1105_v48  ;;  %718 = vmatpush.msra.mxu3 %v575_v51 }
  0xb2   :  { %v1500_v5 = vsel %vm1151_vm6, 4294967295, %v1499_v5  ;;  %vm1159_vm11 = vmor %vm1117_vm3, %vm224_vm13 }
  0xb3   :  { %v1502_v7 = vsel %vm1159_vm11, 4294967295, %v1501_v7  ;;  %vm1167_vm4 = vmor %vm1124_vm1, %vm215_vm8  ;;  %719 = vmatpush.msra.mxu3 %v574_v56 }
  0xb4   :  { %v1504_v10 = vsel %vm1167_vm4, 4294967295, %v1503_v10  ;;  %774 = vset.pattern.permute.xlu2 %v839_v31  ;;  %vm1174_vm12 = vmor %vm1130_vm9, %vm216_vm15  ;;  %vm1509_vm15 = vnez %v1461_v14  ;;  %vm1510_vm4 = vnez %v1463_v16  ;;  %v555_v16 = vld [vmem:[#allocation2 + $0x30] sm:$0xff] }
  0xb5   :  { %v1506_v11 = vsel %vm1174_vm12, 4294967295, %v1505_v11  ;;  %773 = vset.pattern.permute.xlu1 %v840_v35  ;;  %311 = vperm.xlu2 %774, %v299_v0   ;;  %vm1185_vm13 = vmor %vm1143_vm14, %vm220_vm10  ;;  %v303_v35 = vadd.s32 158, %v907_v8  ;;  %v569_v8 = vld [vmem:[#allocation2 + $0xa0] sm:$0xff]  ;;  %v567_v0 = vld [vmem:[#allocation2 + $0x90] sm:$0xff] }
  0xb6   :  { %255 = vperm.xlu1 %773, %v243_v3   ;;  %v156_v12 = vpop.permute.xlu1 %155  ;;  %706 = vmatpush.msra.mxu2 %v555_v16 }
  0xb7   :  { %vm169_vm3 = vcmp.eq.s32.totalorder %v953_v52, %v156_v12  ;;  %vm170_vm1 = vcmp.eq.s32.totalorder %v957_v55, %v156_v12  ;;  %v212_v1 = vpop.permute.xlu0 %211  ;;  %v1181_v13 = vpop.permute.xlu2 %258  ;;  %590 = vmatpush.msra.mxu0 %v555_v16 }
  0xb8   :  { %vm183_vm9 = vmor %vm1509_vm15, %vm169_vm3  ;;  %vm225_vm8 = vcmp.eq.s32.totalorder %v953_v52, %v212_v1  ;;  %vm226_vm12 = vcmp.eq.s32.totalorder %v957_v55, %v212_v1  ;;  %vm276_vm10 = vcmp.eq.s32.totalorder %v957_v55, %v1181_v13  ;;  %707 = vmatpush.msra.mxu2 %v554_v25  ;;  %v1525_v1 = vmov 0 }
  0xb9   :  { %vm184_vm11 = vmor %vm1510_vm4, %vm170_vm1  ;;  %591 = vmatpush.msra.mxu0 %v554_v25 }
  0xba   :  { %vm1196_vm14 = vmor %vm183_vm9, %vm225_vm8  ;;  %708 = vmatpush.msra.mxu2 %v553_v37  ;;  %vm219_vm9 = vcmp.eq.s32.totalorder %v953_v52, %v1105_v48  ;;  %v1523_v48 = vmov 0 }
  0xbb   :  { %vm1202_vm3 = vmor %vm184_vm11, %vm226_vm12  ;;  %592 = vmatpush.msra.mxu0 %v553_v37 }
  0xbc   :  { %vm1209_vm4 = vmor %vm1185_vm13, %vm276_vm10  ;;  %709 = vmatpush.msra.mxu2 %v552_v41 }
  0xbd   :  { %323 = vperm.xlu2 %774, %v303_v35   ;;  %593 = vmatpush.msra.mxu0 %v552_v41  ;;  %v1527_v35 = vmov 0 }
  0xbe   :  { %776 = vset.pattern.permute.xlu1 %v842_v44  ;;  %710 = vmatpush.msra.mxu2 %v551_v33 }
  0xbf   :  { %367 = vperm.xlu1 %776, %v355_v22   ;;  %v200_v26 = vpop.permute.xlu1 %199  ;;  %594 = vmatpush.msra.mxu0 %v551_v33 }
  0xc0   :  { %vm217_vm11 = vcmp.eq.s32.totalorder %v953_v52, %v200_v26  ;;  %vm218_vm12 = vcmp.eq.s32.totalorder %v957_v55, %v200_v26  ;;  %v1216_v28 = vpop.permute.xlu0 %314  ;;  %711 = vmatpush.msra.mxu2 %v550_v50  ;;  %v427_v59 = vpop.permute.xlu2 %426 }
  0xc1   :  { %vm1220_vm1 = vmor %vm1069_vm7, %vm217_vm11  ;;  %vm332_vm13 = vcmp.eq.s32.totalorder %v957_v55, %v1216_v28  ;;  %595 = vmatpush.msra.mxu0 %v550_v50 }
  0xc2   :  { %v1518_v40 = vsel %vm1220_vm1, 4294967295, %v1517_v40  ;;  %vm1228_vm15 = vmor %vm1084_vm5, %vm218_vm12  ;;  %712 = vmatpush.msra.mxu2 %v549_v54  ;;  %vm163_vm5 = vcmp.eq.s32.totalorder %v953_v52, %v1135_v4  ;;  %vm443_vm1 = vcmp.eq.s32.totalorder %v953_v52, %v427_v59 }
  0xc3   :  { %v1520_v42 = vsel %vm1228_vm15, 4294967295, %v1519_v42  ;;  %vm1235_vm7 = vmor %vm1209_vm4, %vm332_vm13  ;;  %596 = vmatpush.msra.mxu0 %v549_v54  ;;  %vm275_vm4 = vcmp.eq.s32.totalorder %v953_v52, %v1181_v13 }
  0xc4   :  { %vm177_vm8 = vmor %vm1043_vm2, %vm163_vm5  ;;  %vm331_vm5 = vcmp.eq.s32.totalorder %v953_v52, %v1216_v28 }
  0xc5   :  { %778 = vset.pattern.permute.xlu2 %v842_v44  ;;  %v573_v44 = vld [vmem:[#allocation2 + $0xc0] sm:$0xff]  ;;  %vm233_vm10 = vmor %vm177_vm8, %vm219_vm9 }
  0xc6   :  { %379 = vperm.xlu2 %778, %v359_v45   ;;  %626 = vmatpush.msra.mxu1 %v573_v44  ;;  %vm289_vm8 = vmor %vm233_vm10, %vm275_vm4 }
  0xc7   :  { %777 = vset.pattern.permute.xlu1 %v841_v43  ;;  %v1242_v53 = vpop.permute.xlu1 %205  ;;  %v572_v43 = vld [vmem:[#allocation2 + $0xb8] sm:$0xff]  ;;  %720 = vmatpush.msra.mxu3 %v573_v44 }
  0xc8   :  { %423 = vperm.xlu1 %777, %v411_v38   ;;  %627 = vmatpush.msra.mxu1 %v572_v43 }
  0xc9   :  { %v1244_v2 = vpop.permute.xlu0 %261  ;;  %721 = vmatpush.msra.mxu3 %v572_v43  ;;  %v1259_v3 = vpop.permute.xlu2 %305 }
  0xca   :  { %628 = vmatpush.msra.mxu1 %v571_v60 }
  0xcb   :  { %722 = vmatpush.msra.mxu3 %v571_v60 }
  0xcc   :  { %629 = vmatpush.msra.mxu1 %v570_v62 }
  0xcd   :  { %723 = vmatpush.msra.mxu3 %v570_v62 }
  0xce   :  { %779 = vset.pattern.permute.xlu2 %v843_v49  ;;  %v568_v49 = vld [vmem:[#allocation2 + $0x98] sm:$0xff]  ;;  %630 = vmatpush.msra.mxu1 %v569_v8 }
  0xcf   :  { %491 = vperm.xlu2 %779, %v471_v57   ;;  %724 = vmatpush.msra.mxu3 %v569_v8 }
  0xd0   :  { %435 = vperm.xlu1 %777, %v415_v58   ;;  %v1249_v61 = vpop.permute.xlu1 %249  ;;  %631 = vmatpush.msra.mxu1 %v568_v49 }
  0xd1   :  { %v1251_v63 = vpop.permute.xlu0 %264  ;;  %725 = vmatpush.msra.mxu3 %v568_v49  ;;  %v1285_v13 = vpop.permute.xlu2 %317 }
  0xd2   :  { %632 = vmatpush.msra.mxu1 %v567_v0 }
  0xd3   :  { %726 = vmatpush.msra.mxu3 %v567_v0 }
  0xd4   :  { %633 = vmatpush.msra.mxu1 %v566_v9 }
  0xd5   :  { %727 = vmatpush.msra.mxu3 %v566_v9 }
  0xd6   :  { %634 = vmatpush.msra.mxu1 %v565_v27 }
  0xd7   :  { %728 = vmatpush.msra.mxu3 %v565_v27 }
  0xd9   :  { %v268_v12 = vpop.permute.xlu0 %267  ;;  %v371_v4 = vpop.permute.xlu1 %370 }
  0xda   :  { %vm281_vm11 = vcmp.eq.s32.totalorder %v953_v52, %v268_v12  ;;  %vm282_vm12 = vcmp.eq.s32.totalorder %v957_v55, %v268_v12  ;;  %vm388_vm13 = vcmp.eq.s32.totalorder %v957_v55, %v371_v4  ;;  %vm387_vm15 = vcmp.eq.s32.totalorder %v953_v52, %v371_v4  ;;  %v374_v21 = vpop.permute.xlu2 %373 }
  0xdb   :  { %vm1267_vm2 = vmor %vm1196_vm14, %vm281_vm11 }
  0xdc   :  { %v1524_v48 = vsel %vm1267_vm2, 4294967295, %v1523_v48  ;;  %vm1276_vm9 = vmor %vm1202_vm3, %vm282_vm12  ;;  %vm444_vm2 = vcmp.eq.s32.totalorder %v957_v55, %v427_v59 }
  0xdd   :  { %v1526_v1 = vsel %vm1276_vm9, 4294967295, %v1525_v1  ;;  %vm402_vm14 = vmor %vm1235_vm7, %vm388_vm13  ;;  %vm1529_vm13 = vnez %v1465_v18 }
  0xde   :  { %vm345_vm11 = vmor %vm289_vm8, %vm331_vm5  ;;  %vm214_vm8 = vcmp.eq.s32.totalorder %v957_v55, %v1079_v36 }
  0xdf   :  { %vm401_vm6 = vmor %vm345_vm11, %vm387_vm15  ;;  %vm157_vm15 = vcmp.eq.s32.totalorder %v953_v52, %v1077_v34 }
  0xe0   :  { %vm458_vm3 = vmor %vm402_vm14, %vm444_vm2  ;;  %vm158_vm2 = vcmp.eq.s32.totalorder %v957_v55, %v1077_v34  ;;  %vm221_vm14 = vcmp.eq.s32.totalorder %v953_v52, %v1242_v53 }
  0xe1   :  { %vm457_vm12 = vmor %vm401_vm6, %vm443_vm1  ;;  %vm213_vm6 = vcmp.eq.s32.totalorder %v953_v52, %v1079_v36  ;;  %vm1530_vm1 = vnez %v1467_v19  ;;  %v1534_v19 = vmov 0  ;;  %v1536_v36 = vmov 0 }
  0xe2   :  { %v483_v31 = vpop.permute.xlu1 %482  ;;  %vm171_vm5 = vmor %vm1529_vm13, %vm157_vm15  ;;  %vm270_vm15 = vcmp.eq.s32.totalorder %v957_v55, %v1249_v61 }
  0xe3   :  { %vm499_vm10 = vcmp.eq.s32.totalorder %v953_v52, %v483_v31  ;;  %vm500_vm4 = vcmp.eq.s32.totalorder %v957_v55, %v483_v31  ;;  %vm227_vm11 = vmor %vm171_vm5, %vm213_vm6  ;;  %vm277_vm5 = vcmp.eq.s32.totalorder %v953_v52, %v1244_v2  ;;  %vm325_vm6 = vcmp.eq.s32.totalorder %v953_v52, %v1259_v3  ;;  %v474_v29 = vpop.permute.xlu0 %473 }
  0xe4   :  { %vm513_vm9 = vmor %vm457_vm12, %vm499_vm10 }
  0xe5   :  { %v689_v17 = vsel %vm513_vm9, 1.0, %v844_v15  ;;  %vm1290_vm7 = vmor %vm458_vm3, %vm500_vm4  ;;  %vm222_vm3 = vcmp.eq.s32.totalorder %v957_v55, %v1242_v53  ;;  %vm269_vm4 = vcmp.eq.s32.totalorder %v953_v52, %v1249_v61 }
  0xe6   :  { %v1528_v35 = vsel %vm1290_vm7, 4294967295, %v1527_v35  ;;  %606 = vmatmul.f32.vlgmr.msra.gmra.mxu2 %v689_v17  ;;  %vm172_vm9 = vmor %vm1530_vm1, %vm158_vm2  ;;  %vm1531_vm2 = vnez %v1479_v30  ;;  %v486_v30 = vpop.permute.xlu2 %485 }
  0xe7   :  { %vm228_vm10 = vmor %vm172_vm9, %vm214_vm8  ;;  %vm326_vm9 = vcmp.eq.s32.totalorder %v957_v55, %v1259_v3  ;;  %vm278_vm8 = vcmp.eq.s32.totalorder %v957_v55, %v1244_v2 }
  0xe8   :  { %vm235_vm12 = vmor %vm1056_vm0, %vm221_vm14 }
  0xe9   :  { %vm1318_vm13 = vmor %vm1531_vm2, %vm222_vm3 }
  0xea   :  { %vm283_vm1 = vmor %vm227_vm11, %vm269_vm4 }
  0xeb   :  { %v362_v20 = vpop.permute.xlu1 %361  ;;  %vm284_vm0 = vmor %vm228_vm10, %vm270_vm15  ;;  %vm493_vm15 = vcmp.eq.s32.totalorder %v953_v52, %v474_v29 }
  0xec   :  { %vm1330_vm14 = vmor %vm235_vm12, %vm277_vm5  ;;  %vm381_vm3 = vcmp.eq.s32.totalorder %v953_v52, %v362_v20  ;;  %vm382_vm7 = vcmp.eq.s32.totalorder %v957_v55, %v362_v20 }
  0xed   :  { %v1535_v19 = vsel %vm1330_vm14, 4294967295, %v1534_v19  ;;  %vm339_vm2 = vmor %vm283_vm1, %vm325_vm6  ;;  %vm494_vm6 = vcmp.eq.s32.totalorder %v957_v55, %v474_v29 }
  0xee   :  { %vm340_vm11 = vmor %vm284_vm0, %vm326_vm9  ;;  %vm333_vm9 = vcmp.eq.s32.totalorder %v953_v52, %v1285_v13  ;;  %v309_v23 = vpop.permute.xlu2 %308 }
  0xef   :  { %vm1339_vm10 = vmor %vm1318_vm13, %vm278_vm8  ;;  %vm389_vm8 = vcmp.eq.s32.totalorder %v953_v52, %v374_v21 }
  0xf0   :  { %v1537_v36 = vsel %vm1339_vm10, 4294967295, %v1536_v36  ;;  %vm395_vm12 = vmor %vm339_vm2, %vm381_vm3  ;;  %vm334_vm3 = vcmp.eq.s32.totalorder %v957_v55, %v1285_v13 }
  0xf1   :  { %vm396_vm5 = vmor %vm340_vm11, %vm382_vm7  ;;  %vm1538_vm7 = vnez %v1535_v19  ;;  %vm390_vm11 = vcmp.eq.s32.totalorder %v957_v55, %v374_v21 }
  0xf2   :  { %vm347_vm2 = vmor %vm1538_vm7, %vm333_vm9  ;;  %vm502_vm9 = vcmp.eq.s32.totalorder %v957_v55, %v486_v30  ;;  %vm280_vm7 = vcmp.eq.s32.totalorder %v957_v55, %v1251_v63 }
  0xf4   :  { %v418_v34 = vpop.permute.xlu1 %417 }
  0xf5   :  { %vm437_vm4 = vcmp.eq.s32.totalorder %v953_v52, %v418_v34  ;;  %vm438_vm14 = vcmp.eq.s32.totalorder %v957_v55, %v418_v34 }
  0xf6   :  { %vm451_vm1 = vmor %vm395_vm12, %vm437_vm4  ;;  %v321_v28 = vpop.permute.xlu2 %320 }
  0xf7   :  { %vm507_vm0 = vmor %vm451_vm1, %vm493_vm15  ;;  %vm501_vm15 = vcmp.eq.s32.totalorder %v953_v52, %v486_v30 }
  0xf8   :  { %v683_v14 = vsel %vm507_vm0, 1.0, %v844_v15  ;;  %vm452_vm13 = vmor %vm396_vm5, %vm438_vm14  ;;  %vm1539_vm5 = vnez %v1537_v36 }
  0xf9   :  { %597 = vmatmul.f32.vlgmr.msra.gmra.mxu0 %v683_v14  ;;  %vm508_vm10 = vmor %vm452_vm13, %vm494_vm6 }
  0xfa   :  { %v684_v22 = vsel %vm508_vm10, 1.0, %v844_v15  ;;  %vm403_vm4 = vmor %vm347_vm2, %vm389_vm8 }
  0xfb   :  { %635 = vmatmul.f32.vlgmr.msra.gmra.mxu1 %v684_v22  ;;  %vm348_vm6 = vmor %vm1539_vm5, %vm334_vm3  ;;  %vm279_vm3 = vcmp.eq.s32.totalorder %v953_v52, %v1251_v63  ;;  %vm335_vm5 = vcmp.eq.s32.totalorder %v953_v52, %v321_v28 }
  0xfc   :  { %v430_v16 = vpop.permute.xlu1 %429  ;;  %vm404_vm0 = vmor %vm348_vm6, %vm390_vm11  ;;  %vm1540_vm11 = vnez %v1500_v5  ;;  %vm327_vm6 = vcmp.eq.s32.totalorder %v953_v52, %v309_v23  ;;  %v1544_v5 = vmov 0 }
  0xfd   :  { %vm445_vm12 = vcmp.eq.s32.totalorder %v953_v52, %v430_v16  ;;  %vm446_vm1 = vcmp.eq.s32.totalorder %v957_v55, %v430_v16 }
  0xfe   :  { %vm459_vm14 = vmor %vm403_vm4, %vm445_vm12  ;;  %v377_v37 = vpop.permute.xlu2 %376 }
  0xff   :  { %vm515_vm10 = vmor %vm459_vm14, %vm501_vm15  ;;  %vm1541_vm15 = vnez %v1502_v7  ;;  %v477_v7 = vpop.permute.xlu0 %476 }
 0x100   :  { %v691_v24 = vsel %vm515_vm10, 1.0, %v844_v15  ;;  %vm460_vm13 = vmor %vm404_vm0, %vm446_vm1  ;;  %vm336_vm1 = vcmp.eq.s32.totalorder %v957_v55, %v321_v28  ;;  %vm1542_vm0 = vnez %v1504_v10  ;;  %vm328_vm10 = vcmp.eq.s32.totalorder %v957_v55, %v309_v23 }
 0x101   :  { %609 = vmatmul.f32.gmra.mxu2 %v691_v24  ;;  %vm516_vm8 = vmor %vm460_vm13, %vm502_vm9  ;;  %vm1543_vm13 = vnez %v1506_v11 }
 0x102   :  { %v692_v25 = vsel %vm516_vm8, 1.0, %v844_v15  ;;  %vm293_vm4 = vmor %vm1540_vm11, %vm279_vm3 }
 0x103   :  { %647 = vmatmul.f32.vlgmr.msra.gmra.mxu3 %v692_v25  ;;  %vm294_vm14 = vmor %vm1541_vm15, %vm280_vm7 }
 0x104   :  { %vm1382_vm3 = vmor %vm293_vm4, %vm335_vm5  ;;  %vm495_vm4 = vcmp.eq.s32.totalorder %v953_v52, %v477_v7 }
 0x105   :  { %v253_v26 = vpop.permute.xlu1 %252  ;;  %v1545_v5 = vsel %vm1382_vm3, 4294967295, %v1544_v5  ;;  %vm1387_vm11 = vmor %vm294_vm14, %vm336_vm1  ;;  %vm496_vm1 = vcmp.eq.s32.totalorder %v957_v55, %v477_v7 }
 0x106   :  { %vm271_vm2 = vcmp.eq.s32.totalorder %v953_v52, %v253_v26  ;;  %vm272_vm12 = vcmp.eq.s32.totalorder %v957_v55, %v253_v26  ;;  %v1547_v39 = vsel %vm1387_vm11, 4294967295, %v1546_v39  ;;  %v489_v11 = vpop.permute.xlu2 %488  ;;  %vm391_vm11 = vcmp.eq.s32.totalorder %v953_v52, %v377_v37 }
 0x107   :  { %vm285_vm9 = vmor %vm1542_vm0, %vm271_vm2  ;;  %v480_v54 = vpop.permute.xlu0 %479 }
 0x108   :  { %vm286_vm8 = vmor %vm1543_vm13, %vm272_vm12 }
 0x109   :  { %vm341_vm15 = vmor %vm285_vm9, %vm327_vm6  ;;  %vm392_vm9 = vcmp.eq.s32.totalorder %v957_v55, %v377_v37 }
 0x10a   :  { %vm342_vm2 = vmor %vm286_vm8, %vm328_vm10 }
 0x10e   :  { %v365_v32 = vpop.permute.xlu1 %364 }
 0x10f   :  { %vm383_vm7 = vcmp.eq.s32.totalorder %v953_v52, %v365_v32  ;;  %vm384_vm0 = vcmp.eq.s32.totalorder %v957_v55, %v365_v32  ;;  %v312_v47 = vpop.permute.xlu2 %311 }
 0x110   :  { %vm397_vm13 = vmor %vm341_vm15, %vm383_vm7  ;;  %vm1548_vm7 = vnez %v1545_v5 }
 0x111   :  { %vm398_vm5 = vmor %vm342_vm2, %vm384_vm0  ;;  %vm503_vm0 = vcmp.eq.s32.totalorder %v953_v52, %v489_v11  ;;  %vm1549_vm2 = vnez %v1547_v39 }
 0x112   :  { %vm405_vm15 = vmor %vm1548_vm7, %vm391_vm11 }
 0x117   :  { %v421_v10 = vpop.permute.xlu1 %420  ;;  %v324_v50 = vpop.permute.xlu2 %323 }
 0x118   :  { %vm439_vm12 = vcmp.eq.s32.totalorder %v953_v52, %v421_v10  ;;  %vm440_vm3 = vcmp.eq.s32.totalorder %v957_v55, %v421_v10 }
 0x119   :  { %vm453_vm14 = vmor %vm397_vm13, %vm439_vm12 }
 0x11a   :  { %vm509_vm6 = vmor %vm453_vm14, %vm495_vm4 }
 0x11b   :  { %v685_v41 = vsel %vm509_vm6, 1.0, %v844_v15  ;;  %vm454_vm10 = vmor %vm398_vm5, %vm440_vm3  ;;  %vm504_vm3 = vcmp.eq.s32.totalorder %v957_v55, %v489_v11 }
 0x11c   :  { %600 = vmatmul.f32.gmra.mxu0 %v685_v41  ;;  %vm510_vm8 = vmor %vm454_vm10, %vm496_vm1  ;;  %vm329_vm10 = vcmp.eq.s32.totalorder %v953_v52, %v312_v47 }
 0x11d   :  { %v686_v45 = vsel %vm510_vm8, 1.0, %v844_v15  ;;  %vm406_vm12 = vmor %vm1549_vm2, %vm392_vm9  ;;  %vm1550_vm8 = vnez %v1518_v40 }
 0x11e   :  { %638 = vmatmul.f32.gmra.mxu1 %v686_v45 }
 0x11f   :  { %v433_v46 = vpop.permute.xlu1 %432 }
 0x120   :  { %vm447_vm13 = vcmp.eq.s32.totalorder %v953_v52, %v433_v46  ;;  %vm448_vm4 = vcmp.eq.s32.totalorder %v957_v55, %v433_v46  ;;  %v380_v53 = vpop.permute.xlu2 %379 }
 0x121   :  { %vm461_vm5 = vmor %vm405_vm15, %vm447_vm13  ;;  %vm330_vm15 = vcmp.eq.s32.totalorder %v957_v55, %v312_v47 }
 0x122   :  { %vm517_vm1 = vmor %vm461_vm5, %vm503_vm0  ;;  %vm1551_vm0 = vnez %v1520_v42 }
 0x123   :  { %v693_v33 = vsel %vm517_vm1, 1.0, %v844_v15  ;;  %vm462_vm11 = vmor %vm406_vm12, %vm448_vm4 }
 0x124   :  { %612 = vmatmul.f32.gmra.mxu2 %v693_v33  ;;  %vm518_vm14 = vmor %vm462_vm11, %vm504_vm3 }
 0x125   :  { %v694_v38 = vsel %vm518_vm14, 1.0, %v844_v15 }
 0x126   :  { %650 = vmatmul.f32.gmra.mxu3 %v694_v38 }
 0x128   :  { %v256_v6 = vpop.permute.xlu1 %255 }
 0x129   :  { %vm273_vm6 = vcmp.eq.s32.totalorder %v953_v52, %v256_v6  ;;  %vm274_vm9 = vcmp.eq.s32.totalorder %v957_v55, %v256_v6  ;;  %v492_v2 = vpop.permute.xlu2 %491 }
 0x12a   :  { %vm287_vm7 = vmor %vm1550_vm8, %vm273_vm6  ;;  %vm497_vm6 = vcmp.eq.s32.totalorder %v953_v52, %v480_v54 }
 0x12b   :  { %vm288_vm2 = vmor %vm1551_vm0, %vm274_vm9  ;;  %vm337_vm9 = vcmp.eq.s32.totalorder %v953_v52, %v324_v50 }
 0x12c   :  { %vm343_vm13 = vmor %vm287_vm7, %vm329_vm10  ;;  %vm338_vm7 = vcmp.eq.s32.totalorder %v957_v55, %v324_v50  ;;  %vm498_vm10 = vcmp.eq.s32.totalorder %v957_v55, %v480_v54 }
 0x12d   :  { %vm344_vm3 = vmor %vm288_vm2, %vm330_vm15  ;;  %vm393_vm2 = vcmp.eq.s32.totalorder %v953_v52, %v380_v53 }
 0x131   :  { %v368_v51 = vpop.permute.xlu1 %367 }
 0x132   :  { %vm385_vm12 = vcmp.eq.s32.totalorder %v953_v52, %v368_v51  ;;  %vm386_vm4 = vcmp.eq.s32.totalorder %v957_v55, %v368_v51 }
 0x133   :  { %vm399_vm5 = vmor %vm343_vm13, %vm385_vm12  ;;  %vm1552_vm13 = vnez %v1524_v48 }
 0x134   :  { %vm400_vm1 = vmor %vm344_vm3, %vm386_vm4  ;;  %vm394_vm3 = vcmp.eq.s32.totalorder %v957_v55, %v380_v53 }
 0x135   :  { %vm351_vm4 = vmor %vm1552_vm13, %vm337_vm9  ;;  %vm506_vm9 = vcmp.eq.s32.totalorder %v957_v55, %v492_v2 }
 0x13a   :  { %v424_v56 = vpop.permute.xlu1 %423 }
 0x13b   :  { %vm441_vm11 = vcmp.eq.s32.totalorder %v953_v52, %v424_v56  ;;  %vm442_vm14 = vcmp.eq.s32.totalorder %v957_v55, %v424_v56 }
 0x13c   :  { %vm455_vm8 = vmor %vm399_vm5, %vm441_vm11  ;;  %vm1553_vm5 = vnez %v1526_v1 }
 0x13d   :  { %vm511_vm0 = vmor %vm455_vm8, %vm497_vm6 }
 0x13e   :  { %v687_v40 = vsel %vm511_vm0, 1.0, %v844_v15  ;;  %vm456_vm15 = vmor %vm400_vm1, %vm442_vm14  ;;  %vm505_vm0 = vcmp.eq.s32.totalorder %v953_v52, %v492_v2 }
 0x13f   :  { %603 = vmatmul.f32.gmra.mxu0 %v687_v40  ;;  %vm512_vm12 = vmor %vm456_vm15, %vm498_vm10 }
 0x140   :  { %v688_v42 = vsel %vm512_vm12, 1.0, %v844_v15  ;;  %vm352_vm11 = vmor %vm1553_vm5, %vm338_vm7  ;;  %vm1554_vm7 = vnez %v1528_v35 }
 0x141   :  { %641 = vmatmul.f32.gmra.mxu1 %v688_v42  ;;  %vm407_vm6 = vmor %vm351_vm4, %vm393_vm2  ;;  %v690_v58 = vsel %vm1554_vm7, 1.0, %v844_v15 }
 0x142   :  { %v436_v44 = vpop.permute.xlu1 %435  ;;  %vm408_vm8 = vmor %vm352_vm11, %vm394_vm3 }
 0x143   :  { %vm449_vm1 = vcmp.eq.s32.totalorder %v953_v52, %v436_v44  ;;  %vm450_vm14 = vcmp.eq.s32.totalorder %v957_v55, %v436_v44 }
 0x144   :  { %vm463_vm10 = vmor %vm407_vm6, %vm449_vm1 }
 0x145   :  { %vm464_vm15 = vmor %vm408_vm8, %vm450_vm14 }
 0x146   :  { %vm519_vm13 = vmor %vm463_vm10, %vm505_vm0 }
 0x147   :  { %v695_v57 = vsel %vm519_vm13, 1.0, %v844_v15  ;;  %vm520_vm12 = vmor %vm464_vm15, %vm506_vm9 }
 0x148   :  { %615 = vmatmul.f32.gmra.mxu2 %v695_v57  ;;  %v696_v43 = vsel %vm520_vm12, 1.0, %v844_v15 }
 0x149   :  { %644 = vmatmul.f32.gmra.mxu1 %v690_v58  ;;  %653 = vmatmul.f32.gmra.mxu3 %v696_v43 }
 0x169   :  { %v607_v61 = vpop.f32.mrf.mxu2 }
 0x176   :  { %v598_v59 = vpop.f32.mrf.mxu0 }
 0x178   :  { %v636_v60 = vpop.f32.mrf.mxu1 }
 0x179   :  { %v637_v52 = vadd.f32 %v636_v60, %v598_v59 }
 0x17b   :  { %657 = vst [vmem:[#allocation5] sm:$0xff] %v637_v52 }
 0x184   :  { %v610_v55 = vpop.f32.mrf.mxu2 }
 0x186   :  { %v648_v62 = vpop.f32.mrf.mxu3 }
 0x187   :  { %v649_v63 = vadd.f32 %v648_v62, %v610_v55 }
 0x189   :  { %661 = vst [vmem:[#allocation5 + $0x20] sm:$0xff] %v649_v63 }
 0x199   :  { %v601_v8 = vpop.f32.mrf.mxu0 }
 0x19b   :  { %v639_v49 = vpop.f32.mrf.mxu1 }
 0x19c   :  { %v640_v0 = vadd.f32 %v639_v49, %v601_v8 }
 0x19e   :  { %658 = vst [vmem:[#allocation5 + $0x8] sm:$0xff] %v640_v0 }
 0x1a7   :  { %v613_v3 = vpop.f32.mrf.mxu2 }
 0x1a9   :  { %v651_v9 = vpop.f32.mrf.mxu3 }
 0x1aa   :  { %v652_v12 = vadd.f32 %v651_v9, %v613_v3 }
 0x1ac   :  { %662 = vst [vmem:[#allocation5 + $0x28] sm:$0xff] %v652_v12 }
 0x1bc   :  { %v604_v4 = vpop.f32.mrf.mxu0 }
 0x1be   :  { %v642_v27 = vpop.f32.mrf.mxu1 }
 0x1bf   :  { %v643_v48 = vadd.f32 %v642_v27, %v604_v4 }
 0x1c1   :  { %659 = vst [vmem:[#allocation5 + $0x10] sm:$0xff] %v643_v48 }
 0x1c6   :  { %v645_v1 = vpop.f32.mrf.mxu1 }
 0x1c7   :  { %v646_v13 = vadd.f32 %v645_v1, %v607_v61 }
 0x1c9   :  { %660 = vst [vmem:[#allocation5 + $0x18] sm:$0xff] %v646_v13 }
 0x1cb   :  { %v616_v31 = vpop.f32.mrf.mxu2 }
 0x1cc   :  { %v654_v15 = vpop.f32.mrf.mxu3 }
 0x1cd   :  { %v655_v17 = vadd.f32 %v654_v15, %v616_v31 }
 0x1cf   :  { %663 = vst [vmem:[#allocation5 + $0x30] sm:$0xff] %v655_v17 }
 0x1d0   :  { %676 = dma.vmem_to_hbm [thread:$0]  %s669_s29, 896, %s671_s4, [#allocation4], %s833_s14, %s833_s14, %s834_s15  }
 0x1d1   :  { %830 = dma.done.wait [#allocation4], 896  }
 0x1d2   :  { %831 = vsyncadd [#allocation4], 4294966400 }
 0x1d3   :  { %681 = vsyncpa [#allocation3], 1 }
 0x1d4   :  { %682 = vsyncpa [#allocation4], 1 }

</bundles_post_ra>
